<compile_context>
chip_gen: v5e
topology: v5e:2x2
jax: 0.10.0
libtpu: 0.0.40
codegen_flags: <defaults>
</compile_context>

<pallas_src>
import functools
import math
from math import ceil

import numpy as np
import jax
import jax.numpy as jnp
from jax.experimental import pallas as pl
from jax.experimental.pallas import tpu as pltpu


def _blurpool_kernel(a_ref, bt_ref, x_ref, o_ref, *, p, h, ho, wo):
    # a_ref : (Ho, H)    row blur+downsample matrix (padding folded in)
    # bt_ref: (W, Wo)    col blur+downsample matrix (padding folded in)
    # x_ref : (P*H, W)   P unpadded planes, rows stacked
    # o_ref : (P, Ho, Wo)
    # Stage 1: one tall MXU matmul contracting W for all P planes at once.
    t = jnp.dot(x_ref[...], bt_ref[...],
                preferred_element_type=jnp.float32)            # (P*H, Wo) f32
    t = t.reshape(p, h, wo)                                    # free when H % 8 == 0
    # Stage 2: batched contraction over H (batched dot, like flash attention).
    a = jnp.broadcast_to(a_ref[...].astype(jnp.float32), (p, ho, h))
    o = jnp.einsum('poh,phv->pov', a, t,
                   preferred_element_type=jnp.float32)         # (P, Ho, Wo)
    o_ref[...] = o.astype(o_ref.dtype)


def _pad_indices(n, lo, hi, pad_type):
    """Source index in [0, n) for each padded position; -1 means zero."""
    idx = np.arange(-lo, n + hi)
    if pad_type == "reflect":
        idx = np.abs(idx)
        idx = np.where(idx >= n, 2 * (n - 1) - idx, idx)
    elif pad_type == "replicate":
        idx = np.clip(idx, 0, n - 1)
    elif pad_type == "zeros":
        idx = np.where((idx < 0) | (idx >= n), -1, idx)
    else:
        raise ValueError(pad_type)
    return idx


def blurpool(x, *, pad_type="reflect", filt_size=3, stride=2, pad_off=0):
    n, c, h, w = x.shape
    nc = n * c

    # Deterministic "parameters": normalized binomial blur filter.
    a1 = np.asarray({2: [1.0, 1.0], 3: [1.0, 2.0, 1.0],
                     5: [1.0, 4.0, 6.0, 4.0, 1.0]}[filt_size], np.float32)
    a1 = a1 / a1.sum()          # outer(a1, a1) == filt / filt.sum() in PyTorch

    pad_lo = int(1.0 * (filt_size - 1) / 2) + pad_off
    pad_hi = int(ceil(1.0 * (filt_size - 1) / 2)) + pad_off
    hp, wp = h + pad_lo + pad_hi, w + pad_lo + pad_hi
    ho = (hp - filt_size) // stride + 1
    wo = (wp - filt_size) // stride + 1

    # Fold padding + blur + stride into banded matrices (host-side numpy), so
    # the kernel never sees a padded copy:  out = A_eff @ x @ Bt_eff per plane.
    row_idx = _pad_indices(h, pad_lo, pad_hi, pad_type)
    col_idx = _pad_indices(w, pad_lo, pad_hi, pad_type)
    A_eff = np.zeros((ho, h), np.float32)
    for oi in range(ho):
        for ti in range(filt_size):
            src = row_idx[stride * oi + ti]
            if src >= 0:
                A_eff[oi, src] += a1[ti]
    Bt_eff = np.zeros((w, wo), np.float32)
    for oj in range(wo):
        for tj in range(filt_size):
            src = col_idx[stride * oj + tj]
            if src >= 0:
                Bt_eff[src, oj] += a1[tj]
    # Keep operands in the input dtype (halves their DMA for bf16); the MXU
    # accumulates in f32 via preferred_element_type.
    A_j = jnp.asarray(A_eff, dtype=x.dtype)
    Bt_j = jnp.asarray(Bt_eff, dtype=x.dtype)

    # --- generation-aware plane batch size P (VMEM budget) -------------------
    itemsize = jnp.dtype(x.dtype).itemsize
    try:
        vmem_cap = int(pltpu.get_tpu_info().vmem_capacity_bytes)
    except Exception:
        vmem_cap = 64 * 1024 * 1024          # conservative fallback (v7x per-TC)
    vmem_limit = int(vmem_cap * 3 // 4)
    per_plane = (2 * h * w * itemsize        # x block, double-buffered
                 + 2 * ho * wo * itemsize    # out block, double-buffered
                 + h * wo * 4                # f32 stage-1 intermediate
                 + ho * h * 4                # broadcast A slice (f32)
                 + ho * wo * 4)              # f32 stage-2 result
    fixed = (ho * h + w * wo) * (itemsize + 4)
    p = int(max(1, (vmem_limit // 2 - fixed) // per_plane))
    p = min(p, 128, nc)
    if nc >= 2:
        p = min(p, (nc + 1) // 2)            # keep >=2 grid steps (both v7x TCs)
    step = 8 // math.gcd(h, 8)               # keep (P*H) a multiple of 8
    p = max(step, (p // step) * step)

    # Free row-major reshape: (N, C, H, W) -> (N*C*H, W); no padded copy.
    x2d = x.reshape(nc * h, w)

    flops = 2 * nc * (h * w * wo + ho * h * wo)
    bytes_accessed = (x2d.size + nc * ho * wo + A_j.size + Bt_j.size) * itemsize
    try:
        cost = pl.CostEstimate(flops=flops, transcendentals=0,
                               bytes_accessed=bytes_accessed)
    except Exception:
        cost = None

    out = pl.pallas_call(
        functools.partial(_blurpool_kernel, p=p, h=h, ho=ho, wo=wo),
        out_shape=jax.ShapeDtypeStruct((nc, ho, wo), x.dtype),
        grid=(pl.cdiv(nc, p),),
        in_specs=[
            pl.BlockSpec((ho, h), lambda i: (0, 0)),        # A_eff (resident)
            pl.BlockSpec((w, wo), lambda i: (0, 0)),        # Bt_eff (resident)
            pl.BlockSpec((p * h, w), lambda i: (i, 0)),     # P planes per step
        ],
        out_specs=pl.BlockSpec((p, ho, wo), lambda i: (i, 0, 0)),
        compiler_params=pltpu.CompilerParams(
            dimension_semantics=("parallel",),
            vmem_limit_bytes=vmem_limit),
        cost_estimate=cost,
    )(A_j, Bt_j, x2d)
    # Free reshape back to NCHW.
    return out.reshape(n, c, ho, wo)


def _reference(x, *, pad_type="reflect", filt_size=3, stride=2, pad_off=0):
    # Pure-JAX mirror of F.conv2d(self.pad(X), kernel, stride=stride, groups=C)
    n, c, h, w = x.shape
    a = jnp.asarray(
        {2: [1.0, 1.0], 3: [1.0, 2.0, 1.0], 5: [1.0, 4.0, 6.0, 4.0, 1.0]}[filt_size],
        jnp.float32)
    filt = a[:, None] * a[None, :]
    filt = filt / filt.sum()
    pad_lo = int(1.0 * (filt_size - 1) / 2) + pad_off
    pad_hi = int(ceil(1.0 * (filt_size - 1) / 2)) + pad_off
    mode = {"reflect": "reflect", "replicate": "edge", "zeros": "constant"}[pad_type]
    xp = jnp.pad(x, ((0, 0), (0, 0), (pad_lo, pad_hi), (pad_lo, pad_hi)), mode=mode)
    kernel = jnp.broadcast_to(filt[None, None], (c, 1, filt_size, filt_size))
    return jax.lax.conv_general_dilated(
        xp, kernel, window_strides=(stride, stride), padding="VALID",
        dimension_numbers=("NCHW", "OIHW", "NCHW"), feature_group_count=c)


if __name__ == "__main__":
    key = jax.random.PRNGKey(0)
    x = jax.random.normal(key, (2, 4, 16, 16), dtype=jnp.float32)

    out = blurpool(x, pad_type="reflect", filt_size=3, stride=2)
    out = jax.block_until_ready(out)

    assert out.shape == (2, 4, 8, 8), out.shape
    ref = _reference(x)
    np.testing.assert_allclose(np.asarray(out), np.asarray(ref), rtol=1e-5, atol=1e-5)
    print("KERNEL_OK")
</pallas_src>

<mosaic_0001>
module attributes {stable_mosaic.version = 11 : i64} {
  func.func @_blurpool_kernel(%arg0: i32, %arg1: memref<8x16xf32, #tpu.memory_space<vmem>>, %arg2: memref<16x8xf32, #tpu.memory_space<vmem>>, %arg3: memref<64x16xf32, #tpu.memory_space<vmem>>, %arg4: memref<4x8x8xf32, #tpu.memory_space<vmem>>) attributes {dimension_semantics = [#tpu.dimension_semantics<parallel>], iteration_bounds = array<i64: 2>, scalar_prefetch = 0 : i64, scratch_operands = 0 : i64, tpu.core_type = #tpu.core_type<tc>, window_params = [{pipeline_mode = #tpu.pipeline_mode<synchronous>, transform_indices = @transform_0, window_bounds = array<i64: 8, 16>}, {pipeline_mode = #tpu.pipeline_mode<synchronous>, transform_indices = @transform_1, window_bounds = array<i64: 16, 8>}, {transform_indices = @transform_2, window_bounds = array<i64: 64, 16>}, {transform_indices = @transform_3, window_bounds = array<i64: 4, 8, 8>}]} {
    %c0 = arith.constant 0 : index
    %c0_0 = arith.constant 0 : index
    %0 = vector.load %arg3[%c0, %c0_0] : memref<64x16xf32, #tpu.memory_space<vmem>>, vector<64x16xf32>
    %c0_1 = arith.constant 0 : index
    %c0_2 = arith.constant 0 : index
    %1 = vector.load %arg2[%c0_1, %c0_2] : memref<16x8xf32, #tpu.memory_space<vmem>>, vector<16x8xf32>
    %cst = arith.constant dense<0.000000e+00> : vector<64x8xf32>
    %2 = tpu.matmul %0, %1, %cst {dimension_numbers = #tpu.dot_dimension_numbers<[1], [0], [0], [1], [0, 0, 1, 1], [], []>} : vector<64x16xf32>, vector<16x8xf32>, vector<64x8xf32> -> vector<64x8xf32>
    %3 = vector.shape_cast %2 : vector<64x8xf32> to vector<4x16x8xf32>
    %c0_3 = arith.constant 0 : index
    %c0_4 = arith.constant 0 : index
    %4 = vector.load %arg1[%c0_3, %c0_4] : memref<8x16xf32, #tpu.memory_space<vmem>>, vector<8x16xf32>
    %5 = vector.shape_cast %4 : vector<8x16xf32> to vector<1x8x16xf32>
    %6 = vector.broadcast %5 : vector<1x8x16xf32> to vector<4x8x16xf32>
    "tpu.trace_start"() <{level = 10 : i32, message = "poh,phv->pov"}> : () -> ()
    %cst_5 = arith.constant dense<0.000000e+00> : vector<4x8x8xf32>
    %7 = tpu.matmul %6, %3, %cst_5 {dimension_numbers = #tpu.dot_dimension_numbers<[2], [1], [1], [2], [0, 0, 0, 1, 1, 2], [0], [0]>} : vector<4x8x16xf32>, vector<4x16x8xf32>, vector<4x8x8xf32> -> vector<4x8x8xf32>
    "tpu.trace_stop"() : () -> ()
    %c0_6 = arith.constant 0 : index
    %c0_7 = arith.constant 0 : index
    %c0_8 = arith.constant 0 : index
    %8 = vector.load %arg4[%c0_6, %c0_7, %c0_8] : memref<4x8x8xf32, #tpu.memory_space<vmem>>, vector<4x8x8xf32>
    tpu.vector_store %arg4[%c0_6, %c0_7, %c0_8], %7 {strides = array<i32>} : memref<4x8x8xf32, #tpu.memory_space<vmem>>, vector<4x8x8xf32>,
    return
  }
  func.func @transform_0(%arg0: i32) -> (i32, i32) {
    %c0_i32 = arith.constant 0 : i32
    %c0_i32_0 = arith.constant 0 : i32
    %c0_i32_1 = arith.constant 0 : i32
    return %c0_i32, %c0_i32_0 : i32, i32
  }
  func.func @transform_1(%arg0: i32) -> (i32, i32) {
    %c0_i32 = arith.constant 0 : i32
    %c0_i32_0 = arith.constant 0 : i32
    %c0_i32_1 = arith.constant 0 : i32
    return %c0_i32, %c0_i32_0 : i32, i32
  }
  func.func @transform_2(%arg0: i32) -> (i32, i32) {
    %c0_i32 = arith.constant 0 : i32
    %c0_i32_0 = arith.constant 0 : i32
    return %arg0, %c0_i32 : i32, i32
  }
  func.func @transform_3(%arg0: i32) -> (i32, i32, i32) {
    %c0_i32 = arith.constant 0 : i32
    %c0_i32_0 = arith.constant 0 : i32
    %c0_i32_1 = arith.constant 0 : i32
    return %arg0, %c0_i32, %c0_i32_0 : i32, i32, i32
  }
}

</mosaic_0001>

<bundles_post_ra>
// kernel: tpu_custom_call.1
= control target key start
LH: loop header
LB: loop body
LE: loop exit
PB: predicated region body
PF: predicated region fallthrough
CT: control target
= control target key end

     0   :  { %8 = vsyncpa [#allocation3], 0  ;;  %s678_s0 = inlined_call_operand.vmem [shape: f32[8,16], index: 0, kind: input, shape index: {}]   ;;  %s679_s1 = inlined_call_operand.vmem [shape: f32[16,8], index: 1, kind: input, shape index: {}]   ;;  %s680_s2 = inlined_call_operand.vmem [shape: f32[128,16], index: 2, kind: input, shape index: {}]   ;;  %s681_s3 = inlined_call_operand.hbm [shape: f32[8,8,8], index: 3, kind: output, shape index: {}]  }
   0x1   :  { %10 = vsyncpa [#allocation3 + $0x1], 0  ;;  %s573_s12 = smov 0   ;;  %s575_s13 = smov 0  }
   0x2   :  { %s577_s14 = smov 0   ;;  %s579_s15 = smov 0  }
   0x3 LB: > { %s594_s16 = sadd.s32 4294967295, %s549_s15   ;;  %s415_s17 = sadd.s32 4294967294, %s549_s15   ;;  %s549_s15 = sphi %s579_s15, %s687_s15   ;;  %s545_s14 = sphi %s577_s14, %s686_s14   ;;  %s541_s13 = sphi %s575_s13, %s685_s13   ;;  %s537_s12 = sphi %s573_s12, %s684_s12  }
   0x4   : > { %s598_s18 = sadd.s32 1, %s549_s15   ;;  %s91_s19 = sadd.s32 1, %s545_s14 }
   0x5   : > { %s88_s20 = ssub.s32 %s549_s15, %s598_s18  ;;  %p101_p0 = scmp.ne.s32.totalorder %s545_s14, %s541_s13 }
   0x6   : > { %p89_p1 = scmp.eq.s32.totalorder %s88_s20, 0  ;;  %p102_p2 = scmp.eq.s32.totalorder %s594_s16, 1 }
   0x7   : > { %p107_p3 = scmp.ne.s32.totalorder %s541_s13, %s537_s12  ;;  %p108_p4 = scmp.eq.s32.totalorder %s415_s17, 1 }
   0x8   : > { %s609_s21 = scalar_select %p89_p1, %s545_s14, %s91_s19  }
   0x9   : > { %p611_p5 = por %p102_p2, %p101_p0  ;;  %p615_p6 = por %p108_p4, %p107_p3 }
   0xa   : > { %p418_p7 = scmp.ge.s32.totalorder %s549_s15, 1  ;;  %p141_p8 = scmp.lt.s32.totalorder %s549_s15, 3 }
   0xc   : > { %p142_p9 = pnand %p418_p7, %p141_p8 }
   0xd   : > { %s420_s28 = sshll.u32 (!%p142_p9), %s594_s16, 3  ;;  %s162_s8 = sand.u32 (!%p142_p9), 1, %s541_s13  }
   0xe   : > { %145 = sbr.rel (%p142_p9) target bundleno = 304 (0x130), region = 32  ;;  %p166_p10 = scmp.lt.s32.totalorder (!%p142_p9), %s420_s28, 15 }
   0xf   : > { %s419_s9 = sshll.u32 (!%p142_p9), %s162_s8, 5  ;;  %s439_s11 = sshll.u32 (!%p142_p9), %s594_s16, 5 }
  0x10   : > { %s164_s10 = scalar_lea.vmem (!%p142_p9), [#allocation2], %s419_s9  ;;  %s349_s20 = scalar_lea.hbm (!%p142_p9), %s681_s3, %s439_s11 }
  0x11   : > { %s350_s24 = sshll.u32 (!%p142_p9), %s164_s10, 4  ;;  %s352_s25 = sshll.u32 (!%p142_p9), %s349_s20, 4  ;;  %s351_s24 = int_to_ptr.vmem [resolvable:$true] %s350_s24  ;;  %s353_s25 = int_to_ptr.hbm [resolvable:$true] %s352_s25 }
  0x12   : > { %s338_s26 = scalar_lea.sflag (!%p142_p9), [#allocation3], %s162_s8  ;;  %s501_s27 = sshra.s32 (!%p142_p9), %s353_s25, 4  ;;  %s502_s27 = int_to_ptr.hbm [resolvable:$true] %s501_s27 }
  0x13   : > { %v181_v0 = vld [vmem:[%s679_s1 + $0x8] sm:$0xff]  ;;  %v180_v1 = vld [vmem:[%s679_s1] sm:$0xff]  ;;  %s689_s28 = smov (!%p166_p10, %s420_s28), 15  ;;  %vm182_vm0 = vcmask 130048   ;;  %vm332_vm1 = vcmask 64512   ;;  %s507_s30 = scalar_lea.hbm %s681_s3, 64 }
  0x14   : > { %221 = vmatpush.msra.mxu0 %v181_v0  ;;  %441 = vmatpush.msra.mxu2 %v181_v0  ;;  %s421_s29 = sshll.u32 %s689_s28, 3  ;;  %v248_v15 = vld [vmem:[%s678_s0] sm:$0xff]  ;;  %s503_s28 = scalar_lea.hbm %s502_s27, 32 }
  0x15   : > { %442 = vmatpush.msra.mxu3 %v181_v0  ;;  %440 = vmatpush.msra.mxu1 %v181_v0  ;;  %s169_s5 = scalar_lea.vmem %s680_s2, %s421_s29  ;;  %p504_p11 = scmp.ne.s32.totalorder %s502_s27, %s503_s28 }
  0x16   : > { %222 = vmatpush.msra.mxu0 %v180_v1  ;;  %444 = vmatpush.msra.mxu2 %v180_v1  ;;  %v172_v2 = vld [vmem:[%s169_s5] sm:$0xff]  ;;  %v178_v4 = vld [vmem:[%s169_s5 + $0x30] sm:$0xff]  ;;  %v175_v5 = vld [vmem:[%s169_s5 + $0x18] sm:$0xff]  ;;  %p508_p0 = scmp.lt.s32.totalorder %s502_s27, %s681_s3  ;;  %p509_p1 = scmp.lt.s32.totalorder %s507_s30, %s503_s28 }
  0x17   : > { %445 = vmatpush.msra.mxu3 %v180_v1  ;;  %443 = vmatpush.msra.mxu1 %v180_v1  ;;  %v176_v3 = vld [vmem:[%s169_s5 + $0x20] sm:$0xff]  ;;  %v173_v6 = vld [vmem:[%s169_s5 + $0x8] sm:$0xff]  ;;  %v179_v8 = vld [vmem:[%s169_s5 + $0x38] sm:$0xff]  ;;  %p505_p12 = pnand %p504_p11, %p611_p5 }
  0x18   : > { %422 = vmatmul.msk.f32.vlgmr.msra.gmra.mxu0 %vm182_vm0, %v172_v2  ;;  %426 = vmatmul.msk.f32.vlgmr.msra.gmra.mxu2 %vm182_vm0, %v176_v3  ;;  %v177_v7 = vld [vmem:[%s169_s5 + $0x28] sm:$0xff]  ;;  %v174_v9 = vld [vmem:[%s169_s5 + $0x10] sm:$0xff]  ;;  %p510_p2 = por %p509_p1, %p508_p0 }
  0x19   : > { %428 = vmatmul.msk.f32.vlgmr.msra.gmra.mxu3 %vm182_vm0, %v178_v4  ;;  %425 = vmatmul.msk.f32.vlgmr.msra.gmra.mxu1 %vm182_vm0, %v175_v5  ;;  %p506_p13 = pneg %p505_p12 }
  0x1b   : > { %p511_p3 = pnand %p510_p2, %p506_p13 }
  0x20   : > { %423 = vmatmul.msk.f32.gmra.mxu0 %vm182_vm0, %v173_v6  ;;  %427 = vmatmul.msk.f32.gmra.mxu2 %vm182_vm0, %v177_v7 }
  0x21   : > { %429 = vmatmul.msk.f32.gmra.mxu3 %vm182_vm0, %v179_v8 }
  0x28   : > { %424 = vmatmul.msk.f32.gmra.mxu0 %vm182_vm0, %v174_v9 }
  0x95   : > { %v224_v10 = vpop.f32.mrf.mxu0 }
  0x96   : > { %v233_v11 = vpop.f32.mrf.mxu1 }
  0x97   : > { %286 = vmatpush.msrb.mxu2 %v233_v11 }
  0x9b   : > { %v236_v12 = vpop.f32.mrf.mxu2 }
  0x9c   : > { %v242_v13 = vpop.f32.mrf.mxu3 }
  0x9d   : > { %v227_v14 = vpop.f32.mrf.mxu0 }
  0x9e   : > { %266 = vmatpush.msrb.mxu1 %v227_v14 }
  0xa0   : > { %267 = vmatpush.msrb.mxu1 %v224_v10 }
  0xa1   : > { %430 = vmatmul.msk.f32.vlgmr.msrb.gmra.mxu1 %vm182_vm0, %v248_v15 }
  0xa3   : > { %v239_v16 = vpop.f32.mrf.mxu2 }
  0xa4   : > { %306 = vmatpush.msrb.mxu3 %v239_v16  ;;  %v245_v17 = vpop.f32.mrf.mxu3 }
  0xa5   : > { %326 = vmatpush.msra.mxu1 %v245_v17  ;;  %v230_v18 = vpop.f32.mrf.mxu0 }
  0xa6   : > { %307 = vmatpush.msrb.mxu3 %v236_v12  ;;  %287 = vmatpush.msrb.mxu2 %v230_v18 }
  0xa7   : > { %327 = vmatpush.msra.mxu1 %v242_v13  ;;  %431 = vmatmul.msk.f32.vlgmr.msrb.gmra.mxu2 %vm182_vm0, %v248_v15 }
  0xa8   : > { %432 = vmatmul.msk.f32.vlgmr.msrb.gmra.mxu3 %vm182_vm0, %v248_v15 }
  0xa9   : > { %433 = vmatmul.msk.f32.vlgmr.msra.gmra.mxu1 %vm182_vm0, %v248_v15 }
 0x11e   : > { %v269_v19 = vpop.f32.mrf.mxu1 }
 0x11f   : > { %333 = vst.msk [vmem:[%s164_s10] sm:$0xff] %vm332_vm1, %v269_v19 }
 0x126   : > { %v329_v20 = vpop.f32.mrf.mxu1 }
 0x127   : > { %336 = vst.msk [vmem:[%s164_s10 + $0x18] sm:$0xff] %vm332_vm1, %v329_v20 }
 0x12a   : > { %v289_v21 = vpop.f32.mrf.mxu2 }
 0x12b   : > { %334 = vst.msk [vmem:[%s164_s10 + $0x8] sm:$0xff] %vm332_vm1, %v289_v21  ;;  %v309_v22 = vpop.f32.mrf.mxu3 }
 0x12c   : > { %335 = vst.msk [vmem:[%s164_s10 + $0x10] sm:$0xff] %vm332_vm1, %v309_v22 }
 0x12d   : > { %514 = shalt.err (!%p511_p3)
}
 0x12e   : > { %s551_s6 = smov 128   ;;  %s552_s7 = smov 8  }
 0x12f   : > { %446 = dma.vmem_to_hbm [thread:$0]  (%p611_p5), %s351_s24, 512, %s353_s25, %s338_s26, %s551_s6, %s551_s6, %s552_s7  }
 0x130 PF: > { %p452_p4 = scmp.ge.s32.totalorder %s549_s15, 2  ;;  %s367_s8 = sand.u32 1, %s537_s12  }
 0x131   : > { %s368_s9 = scalar_lea.sflag [#allocation3], %s367_s8 }
 0x132   : > { %p449_p7 = pnand %p452_p4, %p615_p6 }
 0x134   : > { %p450_p8 = pneg %p449_p7 }
 0x136   : > { %532 = dma.done.wait (%p450_p8), %s368_s9, 512  }
 0x137   : > { %534 = vsyncadd (%p450_p8), %s368_s9, 4294966784  ;;  %p13_p9 = scmp.ge.s32.totalorder %s598_s18, 4   ;;  %s684_s12 = smov %s541_s13 }
 0x138   : > { %s685_s13 = smov %s545_s14  ;;  %s686_s14 = smov %s609_s21 }
 0x139   : > { %s687_s15 = smov %s598_s18  ;;  %15 = sbr.rel (!%p13_p9) target bundleno = 3 (0x3), region = 67 }
 0x13e   :  { %374 = vsyncpa [#allocation3], 1 }
 0x13f   :  { %376 = vsyncpa [#allocation3 + $0x1], 1 }

</bundles_post_ra>
